<compile_context>
chip_gen: v7x
topology: tpu7x:2x2x1
jax: 0.10.0
libtpu: 0.0.40
codegen_flags: <defaults>
</compile_context>

<pallas_src>
import jax
import jax.numpy as jnp
from jax.experimental import pallas as pl
from jax.experimental.pallas import tpu as pltpu


def _classifier_kernel(w_ref, b_ref, x_ref, o_ref):
    # w_ref: (Cout, Cin)   b_ref: (Cout, 1)
    # x_ref: (Cin, T)      o_ref: (Cout, T)   -- T spatial positions on lanes.
    logits = jnp.dot(w_ref[...], x_ref[...], preferred_element_type=jnp.float32)
    o_ref[...] = (logits + b_ref[...]).astype(o_ref.dtype)


def _pick_tile(hw, cin, cout, budget_bytes=8 << 20):
    """Largest lane-dense tile (multiple of 128) dividing hw within a VMEM budget."""
    if hw % 128 != 0:
        return hw                                # full-extent block is always legal
    per_col = 4 * (cin + cout) * 2               # f32, double-buffered in + out
    cap = max(128, budget_bytes // per_col)
    t = 128
    while t * 2 <= min(hw, cap) and hw % (t * 2) == 0:
        t *= 2
    return t


def classifier_block(x_nchw, params):
    """logits = Conv2d(num_channels -> num_classes, kernel_c, stride_conv)(x)."""
    w, b = params['conv_w'], params['conv_b']    # (Cout, Cin, k, k), (Cout,)
    cout, cin, kh, kw = w.shape
    stride = int(params.get('stride_conv', 1))
    if kh != 1 or kw != 1:
        # TODO(synk): kernel_c > 1 not implemented (CDFNet's ClassifierBlock uses kernel_c=1).
        raise NotImplementedError("classifier_block: only kernel_c == 1 is implemented")

    if stride > 1:                               # 1x1 conv at stride s == subsample, then 1x1
        x_nchw = x_nchw[:, :, ::stride, ::stride]

    N, C, H, W = x_nchw.shape
    assert C == cin, "input channel mismatch"
    HW = H * W
    x2 = x_nchw.reshape(N, cin, HW)              # free reshape (merges trailing dims)

    T = _pick_tile(HW, cin, cout)
    grid = (N, HW // T)

    w2 = w.reshape(cout, cin).astype(jnp.float32)
    b2 = b.reshape(cout, 1).astype(jnp.float32)

    # Explicit VMEM ceiling: double-buffered (Cin+Cout)*T columns + params + headroom.
    vmem_bytes = 4 * (2 * (cin + cout) * T + cout * cin + cout) * 4
    vmem_bytes = int(min(max(vmem_bytes, 4 << 20), 32 << 20))

    out = pl.pallas_call(
        _classifier_kernel,
        out_shape=jax.ShapeDtypeStruct((N, cout, HW), jnp.float32),
        grid_spec=pltpu.PrefetchScalarGridSpec(
            num_scalar_prefetch=0,
            grid=grid,
            in_specs=[
                pl.BlockSpec((cout, cin), lambda n, t: (0, 0)),     # weight (resident)
                pl.BlockSpec((cout, 1), lambda n, t: (0, 0)),       # bias   (resident)
                pl.BlockSpec((None, cin, T), lambda n, t: (n, 0, t)),  # x tile
            ],
            out_specs=pl.BlockSpec((None, cout, T), lambda n, t: (n, 0, t)),
        ),
        compiler_params=pltpu.CompilerParams(
            dimension_semantics=("parallel", "parallel"),
            vmem_limit_bytes=vmem_bytes,
        ),
    )(w2, b2, x2)

    return out.reshape(N, cout, H, W)            # free reshape back to NCHW


def init_params(key, num_channels, num_classes, kernel_c=1, stride_conv=1):
    # PyTorch Conv2d default init: U(-1/sqrt(fan_in), 1/sqrt(fan_in)).
    fan_in = num_channels * kernel_c * kernel_c
    bound = 1.0 / (fan_in ** 0.5)
    kw_, kb_ = jax.random.split(key)
    w = jax.random.uniform(kw_, (num_classes, num_channels, kernel_c, kernel_c),
                           jnp.float32, -bound, bound)
    b = jax.random.uniform(kb_, (num_classes,), jnp.float32, -bound, bound)
    return dict(conv_w=w, conv_b=b, stride_conv=stride_conv)


if __name__ == "__main__":
    # params = {'num_channels': 32, 'num_classes': 4, 'kernel_c': 1, 'stride_conv': 1}
    N, Cin, H, W = 2, 32, 16, 16
    num_classes = 4

    key = jax.random.PRNGKey(0)
    kx, kp = jax.random.split(key)
    x = jax.random.normal(kx, (N, Cin, H, W), jnp.float32)
    params = init_params(kp, Cin, num_classes, kernel_c=1, stride_conv=1)

    logits = classifier_block(x, params)
    jax.block_until_ready(logits)

    # Pure-JAX reference (1x1 conv == per-pixel channel matmul).
    ref = jnp.einsum('oc,nchw->nohw',
                     params['conv_w'].reshape(num_classes, Cin), x,
                     precision=jax.lax.Precision.HIGHEST)
    ref = ref + params['conv_b'].reshape(1, num_classes, 1, 1)

    assert logits.shape == (N, num_classes, H, W)
    assert bool(jnp.all(jnp.isfinite(logits)))
    assert bool(jnp.allclose(logits, ref, rtol=1e-3, atol=1e-3))
    print("KERNEL_OK")
</pallas_src>

<mosaic_0001>
module attributes {stable_mosaic.version = 11 : i64} {
  func.func @_classifier_kernel(%arg0: i32, %arg1: i32, %arg2: memref<4x32xf32, #tpu.memory_space<vmem>>, %arg3: memref<4x1xf32, #tpu.memory_space<vmem>>, %arg4: memref<1x32x256xf32, #tpu.memory_space<vmem>>, %arg5: memref<1x4x256xf32, #tpu.memory_space<vmem>>) attributes {dimension_semantics = [#tpu.dimension_semantics<parallel>, #tpu.dimension_semantics<parallel>], iteration_bounds = array<i64: 2, 1>, scalar_prefetch = 0 : i64, scratch_operands = 0 : i64, tpu.core_type = #tpu.core_type<tc>, window_params = [{pipeline_mode = #tpu.pipeline_mode<synchronous>, transform_indices = @transform_0, window_bounds = array<i64: 4, 32>}, {pipeline_mode = #tpu.pipeline_mode<synchronous>, transform_indices = @transform_1, window_bounds = array<i64: 4, 1>}, {transform_indices = @transform_2, window_bounds = array<i64: 1, 32, 256>}, {transform_indices = @transform_3, window_bounds = array<i64: 1, 4, 256>}]} {
    %c0 = arith.constant 0 : index
    %c0_0 = arith.constant 0 : index
    %0 = vector.load %arg2[%c0, %c0_0] : memref<4x32xf32, #tpu.memory_space<vmem>>, vector<4x32xf32>
    %c0_1 = arith.constant 0 : index
    %c0_2 = arith.constant 0 : index
    %c0_3 = arith.constant 0 : index
    %1 = vector.load %arg4[%c0_1, %c0_2, %c0_3] : memref<1x32x256xf32, #tpu.memory_space<vmem>>, vector<1x32x256xf32>
    %2 = vector.shape_cast %1 : vector<1x32x256xf32> to vector<32x256xf32>
    %cst = arith.constant dense<0.000000e+00> : vector<4x256xf32>
    %3 = tpu.matmul %0, %2, %cst {dimension_numbers = #tpu.dot_dimension_numbers<[1], [0], [0], [1], [0, 0, 1, 1], [], []>} : vector<4x32xf32>, vector<32x256xf32>, vector<4x256xf32> -> vector<4x256xf32>
    %c0_4 = arith.constant 0 : index
    %c0_5 = arith.constant 0 : index
    %4 = vector.load %arg3[%c0_4, %c0_5] : memref<4x1xf32, #tpu.memory_space<vmem>>, vector<4x1xf32>
    %5 = vector.broadcast %4 : vector<4x1xf32> to vector<4x256xf32>
    %6 = arith.addf %3, %5 : vector<4x256xf32>
    %c0_6 = arith.constant 0 : index
    %c0_7 = arith.constant 0 : index
    %c0_8 = arith.constant 0 : index
    %7 = vector.load %arg5[%c0_6, %c0_7, %c0_8] : memref<1x4x256xf32, #tpu.memory_space<vmem>>, vector<1x4x256xf32>
    %8 = vector.shape_cast %7 : vector<1x4x256xf32> to vector<4x256xf32>
    %9 = vector.shape_cast %6 : vector<4x256xf32> to vector<1x4x256xf32>
    tpu.vector_store %arg5[%c0_6, %c0_7, %c0_8], %9 {strides = array<i32>} : memref<1x4x256xf32, #tpu.memory_space<vmem>>, vector<1x4x256xf32>,
    return
  }
  func.func @transform_0(%arg0: i32, %arg1: i32) -> (i32, i32) {
    %c0_i32 = arith.constant 0 : i32
    %c0_i32_0 = arith.constant 0 : i32
    %c0_i32_1 = arith.constant 0 : i32
    return %c0_i32, %c0_i32_0 : i32, i32
  }
  func.func @transform_1(%arg0: i32, %arg1: i32) -> (i32, i32) {
    %c0_i32 = arith.constant 0 : i32
    %c0_i32_0 = arith.constant 0 : i32
    %c0_i32_1 = arith.constant 0 : i32
    return %c0_i32, %c0_i32_0 : i32, i32
  }
  func.func @transform_2(%arg0: i32, %arg1: i32) -> (i32, i32, i32) {
    %c0_i32 = arith.constant 0 : i32
    %c0_i32_0 = arith.constant 0 : i32
    return %arg0, %c0_i32, %arg1 : i32, i32, i32
  }
  func.func @transform_3(%arg0: i32, %arg1: i32) -> (i32, i32, i32) {
    %c0_i32 = arith.constant 0 : i32
    %c0_i32_0 = arith.constant 0 : i32
    return %arg0, %c0_i32, %arg1 : i32, i32, i32
  }
}

</mosaic_0001>

<bundles_post_ra>
// kernel: tpu_custom_call.1
= control target key start
LH: loop header
LB: loop body
LE: loop exit
PB: predicated region body
PF: predicated region fallthrough
CT: control target
= control target key end

     0   :  { %8 = vsyncpa [#allocation3], 0  ;;  %s818_s0 = inlined_call_operand.vmem [shape: f32[4,32], index: 0, kind: input, shape index: {}]   ;;  %s819_s1 = inlined_call_operand.vmem [shape: f32[4,1], index: 1, kind: input, shape index: {}]   ;;  %s820_s2 = inlined_call_operand.hbm [shape: f32[2,32,256], index: 2, kind: input, shape index: {}]   ;;  %s821_s3 = inlined_call_operand.hbm [shape: f32[2,4,256], index: 3, kind: output, shape index: {}]  }
   0x1   :  { %10 = vsyncpa [#allocation3 + $0x1], 0 }
   0x2   :  { %11 = vsyncpa [#allocation4], 0 }
   0x3   :  { %13 = vsyncpa [#allocation4 + $0x1], 0  ;;  %s638_s12 = smov 0   ;;  %s640_s13 = smov 0  }
   0x4   :  { %s642_s14 = smov 0   ;;  %s644_s15 = smov 0  }
   0x5   :  { %s646_s16 = smov 0   ;;  %s648_s17 = smov 0  }
   0x6 LB: > { %s405_s18 = sadd.s32 4294967295, %s610_s17   ;;  %s406_s19 = sadd.s32 4294967294, %s610_s17   ;;  %s610_s17 = sphi %s648_s17, %s19_s17   ;;  %s606_s16 = sphi %s646_s16, %s836_s16   ;;  %s602_s15 = sphi %s644_s15, %s835_s15   ;;  %s598_s14 = sphi %s642_s14, %s834_s14   ;;  %s594_s13 = sphi %s640_s13, %s833_s13   ;;  %s590_s12 = sphi %s638_s12, %s832_s12  }
   0x7   : > { %s31_s20 = sadd.s32 1, %s606_s16  ;;  %s82_s21 = sadd.s32 1, %s598_s14 }
   0x8   : > { %p33_p0 = scmp.ge.s32.totalorder %s31_s20, 2  ;;  %p89_p1 = scmp.ne.s32.totalorder %s598_s14, %s594_s13 }
   0x9   : > { %p90_p2 = scmp.eq.s32.totalorder %s610_s17, 0  ;;  %p95_p3 = scmp.ne.s32.totalorder %s594_s13, %s590_s12 }
   0xa   : > { %s838_s20 = smov (%p33_p0, %s31_s20), 0  ;;  %p96_p5 = scmp.eq.s32.totalorder %s405_s18, 0 }
   0xb   : > { %p679_p4 = por %p90_p2, %p89_p1  ;;  %s77_s23 = ssub.s32 %s606_s16, %s838_s20 }
   0xc   : > { %p121_p6 = scmp.eq.s32.totalorder %s405_s18, 1  ;;  %p80_p7 = scmp.eq.s32.totalorder %s77_s23, 0 }
   0xd   : > { %p685_p8 = por %p96_p5, %p95_p3  ;;  %p127_p10 = scmp.eq.s32.totalorder %s406_s19, 1 }
   0xe   : > { %p689_p9 = por %p121_p6, %p89_p1  ;;  %p443_p13 = scmp.lt.s32.totalorder %s610_s17, 2 }
   0xf   : > { %s694_s26 = scalar_select %p80_p7, %s598_s14, %s82_s21  }
  0x10   : > { %s825_s25 = scalar_select %p689_p9, 1, 0 }
  0x11   : > { %p696_p11 = por %p127_p10, %p95_p3  ;;  %s153_s28 = sand.u32 1, %s598_s14  }
  0x12   : > { %s409_s29 = sshll.u32 %s153_s28, 6  ;;  %s421_s30 = sshll.u32 %s606_s16, 10 }
  0x13   : > { %s826_s27 = scalar_select %p696_p11, 1, 0 }
  0x14   : > { %s707_s6 = scalar_lea.hbm %s820_s2, %s421_s30  ;;  %s157_s7 = scalar_lea.vmem [#allocation2], %s409_s29 }
  0x15   : > { %s166_s8 = sshll.u32 %s157_s7, 4  ;;  %p713_p0 = pnand %p443_p13, %p679_p4  ;;  %s709_s8 = int_to_ptr.vmem [resolvable:$true] %s166_s8 }
  0x16   : > { %s718_s10 = scalar_lea.sflag [#allocation3], %s153_s28  ;;  %s498_s11 = scalar_lea.hbm %s707_s6, 1024 }
  0x17   : > { %p499_p2 = scmp.ne.s32.totalorder %s707_s6, %s498_s11  ;;  %p500_p3 = pneg %p713_p0 }
  0x18   : > { %s503_s21 = scalar_lea.hbm %s820_s2, 2048  ;;  %p504_p4 = scmp.lt.u32.totalorder %s707_s6, %s820_s2 }
  0x19   : > { %p501_p5 = pnand %p500_p3, %p499_p2  ;;  %p505_p7 = scmp.lt.u32.totalorder %s503_s21, %s498_s11 }
  0x1a   : > { %p507_p13 = scmp.lt.u32.totalorder %s498_s11, %s707_s6 }
  0x1b   : > { %p502_p6 = pneg %p501_p5  ;;  %p506_p10 = por %p505_p7, %p504_p4 }
  0x1d   : > { %p508_p12 = por %p507_p13, %p506_p10 }
  0x1f   : > { %p509_p1 = pnand %p508_p12, %p502_p6 }
  0x21   : > { %512 = shalt.err (!%p509_p1)
}
  0x22   : > { %s513_s28 = scalar_lea.vmem %s709_s8, 1024  ;;  %s612_s29 = smov [#allocation2]  }
  0x23   : > { %p514_p2 = scmp.ne.s32.totalorder %s709_s8, %s513_s28  ;;  %s518_s30 = sshll.u32 %s612_s29, 4  ;;  %s519_s30 = int_to_ptr.vmem [resolvable:$false] %s518_s30 }
  0x24   : > { %s520_s4 = scalar_lea.vmem %s519_s30, 2048  ;;  %p521_p9 = scmp.lt.s32.totalorder %s709_s8, %s519_s30 }
  0x25   : > { %p516_p5 = pnand %p514_p2, %p500_p3  ;;  %p522_p4 = scmp.lt.s32.totalorder %s520_s4, %s513_s28 }
  0x27   : > { %p517_p11 = pneg %p516_p5  ;;  %p523_p7 = por %p522_p4, %p521_p9 }
  0x29   : > { %p524_p10 = pnand %p523_p7, %p517_p11 }
  0x2b   : > { %527 = shalt.err (!%p524_p10)
}
  0x2c   : > { %s613_s5 = smov 256   ;;  %s614_s7 = smov 16  }
  0x2d   : > { %438 = dma.hbm_to_vmem [thread:$0]  (!%p713_p0), %s707_s6, 1024, %s709_s8, %s718_s10, %s613_s5, %s613_s5, %s614_s7  }
  0x2e   : > { %p174_p12 = scmp.lt.s32.totalorder %s610_s17, 3  ;;  %p828_p1 = scmp.ge.s32.totalorder %s610_s17, 1 }
  0x30   : > { %p175_p3 = pnand %p828_p1, %p174_p12 }
  0x31   : > { %s750_s11 = sand.u32 (!%p175_p3), 1, %s594_s13  }
  0x32   : > { %178 = sbr.rel (%p175_p3) target bundleno = 300 (0x12c), region = 32  ;;  %s413_s18 = sshll.u32 (!%p175_p3), %s750_s11, 6 }
  0x33   : > { %s181_s19 = scalar_lea.sflag (!%p175_p3), [#allocation3], %s750_s11  ;;  %s184_s21 = scalar_lea.vmem (!%p175_p3), [#allocation2], %s413_s18 }
  0x39   : > { %581 = dma.done.wait (%p685_p8), %s181_s19, 1024  }
  0x3a   : > { %583 = vsyncadd (%p685_p8), %s181_s19, 4294966272  ;;  %v615_v0 = vmov 0.0   ;;  %v616_v1 = vmov 0   ;;  %v211_v2 = vld [vmem:[%s184_s21 + $0x8] sm:$0xff]  ;;  %v213_v3 = vld [vmem:[%s184_s21 + $0x18] sm:$0xff]  ;;  %vm224_vm0 = vcmask 261120  }
  0x3b   : > { %292 = vmatprep.mubr.f32.mxu0 %v615_v0  ;;  %497 = vset.pattern.permute.xlu0 %v616_v1  ;;  %v210_v4 = vld [vmem:[%s184_s21] sm:$0xff]  ;;  %v423_v5 = vpack.c.bf16 %v213_v3, %v211_v2  ;;  %v212_v6 = vld [vmem:[%s184_s21 + $0x10] sm:$0xff]  ;;  %v215_v7 = vld [vmem:[%s184_s21 + $0x28] sm:$0xff]  ;;  %s414_s10 = sshll.u32 %s750_s11, 3  ;;  %s422_s22 = sshll.u32 %s602_s15, 7 }
  0x3c   : > { %v217_v8 = vld [vmem:[%s184_s21 + $0x38] sm:$0xff]  ;;  %v425_v9 = vpack.c.bf16 %v212_v6, %v210_v4  ;;  %v214_v11 = vld [vmem:[%s184_s21 + $0x20] sm:$0xff]  ;;  %v216_v12 = vld [vmem:[%s184_s21 + $0x30] sm:$0xff]  ;;  %s206_s23 = scalar_lea.vmem [#allocation5], %s414_s10  ;;  %s769_s4 = scalar_lea.hbm %s821_s3, %s422_s22 }
  0x3d   : > { %v427_v10 = vpack.c.bf16 %v217_v8, %v215_v7  ;;  %424 = vmatprep.subr.bf16.mxu0 %v423_v5  ;;  %v218_v13 = vld [vmem:[%s819_s1] sm:$0xf]  ;;  %v429_v14 = vpack.c.bf16 %v216_v12, %v214_v11  ;;  %s321_s28 = sshll.u32 %s206_s23, 4  ;;  %s305_s5 = scalar_lea.sflag [#allocation4], %s750_s11  ;;  %s771_s28 = int_to_ptr.vmem [resolvable:$true] %s321_s28 }
  0x3e   : > { %426 = vmatpush1.bf16.msra.mxu0 %v425_v9  ;;  %221 = vperm.xlu0 %497, %v218_v13   ;;  %v209_v15 = vld [vmem:[%s818_s0] sm:$0xf]  ;;  %s528_s7 = scalar_lea.vmem %s771_s28, 128  ;;  %p829_p9 = scmp.ne.s32.totalorder %s825_s25, 0 }
  0x3f   : > { %428 = vmatprep.subr.bf16.mxu0 %v427_v10  ;;  %p529_p8 = scmp.ne.s32.totalorder %s771_s28, %s528_s7  ;;  %s617_s15 = smov [#allocation5]  }
  0x40   : > { %s532_s18 = sshll.u32 %s617_s15, 4  ;;  %s533_s18 = int_to_ptr.vmem [resolvable:$false] %s532_s18 }
  0x41   : > { %p530_p11 = pnand %p529_p8, %p829_p9  ;;  %s534_s19 = scalar_lea.vmem %s533_s18, 256 }
  0x42   : > { %430 = vmatpush1.bf16.msra.mxu0 %v429_v14  ;;  %p535_p6 = scmp.lt.s32.totalorder %s771_s28, %s533_s18  ;;  %p536_p13 = scmp.lt.s32.totalorder %s534_s19, %s528_s7 }
  0x43   : > { %p531_p0 = pneg %p530_p11 }
  0x44   : > { %p537_p2 = por %p536_p13, %p535_p6 }
  0x45   : > { %415 = vmatmul.mubr.msk.f32.vlgmr.msra.gmra.mrb[0].mxu0 %vm224_vm0, %v209_v15 }
  0x46   : > { %p538_p5 = pnand %p537_p2, %p531_p0 }
  0xbd   : > { %v222_v16 = vpop.permute.xlu0 %221 }
 0x118   : > { %v294_v17 = vpop.f32.mrb[0].mxu0 }
 0x119   : > { %v295_v18 = vadd.f32 %v294_v17, %v222_v16  ;;  %v296_v19 = vpop.f32.mrb[1].mxu0 }
 0x11a   : > { %v297_v20 = vadd.f32 %v296_v19, %v222_v16 }
 0x11c   : > { %v301_v21 = vcombine.low %v295_v18, %v297_v20 }
 0x11e   : > { %303 = vst [vmem:[%s206_s23] sm:$0xff] %v301_v21 }
 0x11f   : > { %541 = shalt.err (!%p538_p5)
}
 0x120   : > { %s542_s11 = scalar_lea.hbm %s769_s4, 128  ;;  %s546_s6 = scalar_lea.hbm %s821_s3, 256 }
 0x121   : > { %p543_p4 = scmp.ne.s32.totalorder %s769_s4, %s542_s11  ;;  %p547_p12 = scmp.lt.u32.totalorder %s769_s4, %s821_s3 }
 0x122   : > { %p548_p1 = scmp.lt.u32.totalorder %s546_s6, %s542_s11  ;;  %p550_p8 = scmp.lt.u32.totalorder %s542_s11, %s769_s4 }
 0x123   : > { %p544_p7 = pnand %p543_p4, %p829_p9 }
 0x124   : > { %p549_p3 = por %p548_p1, %p547_p12 }
 0x125   : > { %p545_p10 = pneg %p544_p7 }
 0x126   : > { %p551_p11 = por %p550_p8, %p549_p3 }
 0x128   : > { %p552_p0 = pnand %p551_p11, %p545_p10 }
 0x12a   : > { %555 = shalt.err (!%p552_p0)
}
 0x12b   : > { %433 = dma.vmem_to_hbm [thread:$0]  (%p829_p9), %s771_s28, 128, %s769_s4, %s305_s5  }
 0x12c PF: > { %s333_s10 = sand.u32 1, %s590_s12   ;;  %p830_p6 = scmp.ne.s32.totalorder %s826_s27, 0 }
 0x12d   : > { %p831_p13 = scmp.ge.s32.totalorder %s610_s17, 2  ;;  %s334_s22 = scalar_lea.sflag [#allocation4], %s333_s10 }
 0x12f   : > { %p440_p2 = pnand %p831_p13, %p830_p6 }
 0x131   : > { %585 = dma.done.wait (!%p440_p2), %s334_s22, 128  }
 0x132   : > { %587 = vsyncadd (!%p440_p2), %s334_s22, 4294967168  ;;  %s19_s17 = sadd.s32 1, %s610_s17   ;;  %s832_s12 = smov %s594_s13 }
 0x133   : > { %p16_p5 = scmp.ge.s32.totalorder %s19_s17, 4   ;;  %s833_s13 = smov %s598_s14 }
 0x134   : > { %s834_s14 = smov %s694_s26  ;;  %s835_s15 = smov %s606_s16 }
 0x135   : > { %s836_s16 = smov %s838_s20  ;;  %18 = sbr.rel (!%p16_p5) target bundleno = 6 (0x6), region = 77 }
 0x13c   :  { %339 = vsyncpa [#allocation3], 1 }
 0x13d   :  { %341 = vsyncpa [#allocation3 + $0x1], 1 }
 0x13e   :  { %342 = vsyncpa [#allocation4], 1 }
 0x13f   :  { %344 = vsyncpa [#allocation4 + $0x1], 1 }

</bundles_post_ra>
